<compile_context>
chip_gen: v5e
topology: v5e:2x2
jax: 0.10.0
libtpu: 0.0.40
codegen_flags: <defaults>
</compile_context>

<pallas_src>
from functools import partial

import numpy as np
import jax
import jax.numpy as jnp
from jax import lax
from jax.experimental import pallas as pl
from jax.experimental.pallas import tpu as pltpu


def _round_up(x, m):
    return ((x + m - 1) // m) * m


def _choose_row_tile(R, K, vmem_budget_bytes=20 * 1024 * 1024):
    # 2 double-buffered input tiles (logits [tr,K] + side [tr,8]) plus ~6 f32
    # [tr, K] in-kernel temporaries.
    bytes_per_row = 4 * (2 * (K + 8) + 6 * K)
    tr = max(8, min(2048, vmem_budget_bytes // max(bytes_per_row, 1)))
    tr = (tr // 8) * 8
    return min(tr, _round_up(R, 8))


# ----------------------------------------------------------------------------
# Pallas greedy L1 matcher (stand-in for the Hungarian matcher).
# Inputs are coordinate-major so per-coordinate slices are leading-dim picks:
#   pred_t: [4, B, Q]   tgt_t: [4, B, T]   ->   src_idx: [B, T] int32
# ----------------------------------------------------------------------------
def matcher_kernel(pred_ref, tgt_ref, out_ref):
    pred = pred_ref[...]                       # (4, B, Q)
    tgt = tgt_ref[...]                         # (4, B, T)
    B, Q = pred.shape[1], pred.shape[2]
    T = tgt.shape[2]

    cost = jnp.zeros((B, T, Q), jnp.float32)
    for d in range(4):                         # static 4-coordinate loop
        cost = cost + jnp.abs(pred[d][:, None, :] - tgt[d][:, :, None])

    q_iota = lax.broadcasted_iota(jnp.int32, (B, 1, Q), 2)
    t_iota3 = lax.broadcasted_iota(jnp.int32, (B, T, 1), 1)
    t_iota2 = lax.broadcasted_iota(jnp.int32, (B, T), 1)
    big = jnp.float32(1e30)

    def body(t, carry):
        cost_c, srcs = carry
        # column t of the cost matrix (mask + reduce; no dynamic slicing)
        col = jnp.min(jnp.where(t_iota3 == t, cost_c, big), axis=1, keepdims=True)  # (B,1,Q)
        minv = jnp.min(col, axis=2, keepdims=True)                                   # (B,1,1)
        q = jnp.min(jnp.where(col <= minv, q_iota, Q), axis=2)                       # (B,1) first argmin
        srcs = jnp.where(t_iota2 == t, q, srcs)                                      # (B,T)
        cost_c = jnp.where(q_iota == q[:, :, None], big, cost_c)                     # mark query used
        return cost_c, srcs

    _, srcs = lax.fori_loop(0, T, body, (cost, jnp.zeros((B, T), jnp.int32)))
    out_ref[...] = srcs


def run_matcher(pred_t, tgt_t):
    _, B, Q = pred_t.shape
    T = tgt_t.shape[2]
    return pl.pallas_call(
        matcher_kernel,
        out_shape=jax.ShapeDtypeStruct((B, T), jnp.int32),
        grid=(1,),
        in_specs=[pl.BlockSpec((4, B, Q), lambda i: (0, 0, 0)),
                  pl.BlockSpec((4, B, T), lambda i: (0, 0, 0))],
        out_specs=pl.BlockSpec((B, T), lambda i: (0, 0)),
    )(pred_t, tgt_t)


# ----------------------------------------------------------------------------
# Row-tiled CE + accuracy kernel.  Output is (8 * num_groups, 128) f32; each
# group's 8-row block stays resident across its "arbitrary" step axis and is
# an accumulator (row 0 holds: lane0 sum(w*CE), lane1 sum(w), lane2 #correct,
# lane3 #matched).  Tail rows beyond total_rows are masked in-kernel.
# ----------------------------------------------------------------------------
def ce_kernel(logits_ref, side_ref, out_ref, *, total_rows, steps_per_group):
    g = pl.program_id(0)
    s = pl.program_id(1)

    @pl.when(s == 0)
    def _init():
        out_ref[...] = jnp.zeros_like(out_ref)

    logits = logits_ref[...]                    # (TR, K)
    side = side_ref[...]                        # (TR, 8): col0 tc, col1 w, col2 mask
    TR, K = logits.shape

    tile = g * steps_per_group + s              # un-clamped global tile index
    row = lax.broadcasted_iota(jnp.int32, (TR, 1), 0) + tile * TR
    valid = row < total_rows                    # (TR, 1); kills garbage tail rows

    tc = jnp.where(valid, side[:, 0:1], 0.0).astype(jnp.int32)
    w = jnp.where(valid, side[:, 1:2], 0.0)
    mask = jnp.where(valid, side[:, 2:3], 0.0)
    logits = jnp.where(valid, logits, 0.0)      # zero before exp -> no NaN poisoning

    lane = lax.broadcasted_iota(jnp.int32, (TR, K), 1)
    sel = lane == tc                            # in-kernel "one-hot" (no HBM one-hot)

    m = jnp.max(logits, axis=-1, keepdims=True)
    lse = m + jnp.log(jnp.sum(jnp.exp(logits - m), axis=-1, keepdims=True))
    logit_y = jnp.sum(jnp.where(sel, logits, 0.0), axis=-1, keepdims=True)
    ce = w * (lse - logit_y)                    # (TR, 1)

    # first-index argmax, all in int32 (matches jnp.argmax tie-breaking)
    arg = jnp.min(jnp.where(logits >= m, lane, K), axis=-1, keepdims=True)
    correct = mask * (arg == tc).astype(jnp.float32)

    def rsum(x):                                # (TR, 1) -> (1, 1)
        return jnp.sum(x, axis=0, keepdims=True)

    lane_out = lax.broadcasted_iota(jnp.int32, (1, 128), 1)

    def put(v, i):
        return jnp.where(lane_out == i, v, 0.0)

    out_ref[...] += (put(rsum(ce), 0) + put(rsum(w), 1) +
                     put(rsum(correct), 2) + put(rsum(mask), 3))


def run_ce_kernel(logits, side, total_rows, tr, num_groups):
    _, K = logits.shape
    nt = -(-total_rows // tr)                   # total row tiles
    S = -(-nt // num_groups)                    # tiles per group

    # Clamp so the DMA of a (possibly duplicated) trailing tile stays in
    # bounds; the kernel's row mask (built from the un-clamped tile id) makes
    # the duplicate contribute exactly zero.
    def in_map(g, s):
        return (jnp.minimum(g * S + s, nt - 1), 0)

    return pl.pallas_call(
        partial(ce_kernel, total_rows=total_rows, steps_per_group=S),
        out_shape=jax.ShapeDtypeStruct((8 * num_groups, 128), jnp.float32),
        grid=(num_groups, S),
        in_specs=[pl.BlockSpec((tr, K), in_map),
                  pl.BlockSpec((tr, 8), in_map)],
        out_specs=pl.BlockSpec((8, 128), lambda g, s: (g, 0)),
        compiler_params=pltpu.CompilerParams(
            dimension_semantics=("parallel", "arbitrary"),
            vmem_limit_bytes=32 * 1024 * 1024),
    )(logits, side)


# ----------------------------------------------------------------------------
# Once-only box loss kernel (L1 + GIoU), lane-dense [8, NP] layout:
# rows 0..3 = cx, cy, w, h; boxes along the 128-lane axis.  Output (1, 128):
# lane 0 = L1 sum, lane 1 = sum(1 - GIoU).
# ----------------------------------------------------------------------------
def box_kernel(src_ref, tgt_ref, out_ref):
    s = src_ref[...]
    t = tgt_ref[...]

    l1 = jnp.sum(jnp.sum(jnp.abs(s - t), axis=1, keepdims=True), axis=0, keepdims=True)

    scx, scy, sw, sh = s[0:1, :], s[1:2, :], s[2:3, :], s[3:4, :]
    tcx, tcy, tw, th = t[0:1, :], t[1:2, :], t[2:3, :], t[3:4, :]
    sx0, sy0 = scx - 0.5 * sw, scy - 0.5 * sh
    sx1, sy1 = scx + 0.5 * sw, scy + 0.5 * sh
    tx0, ty0 = tcx - 0.5 * tw, tcy - 0.5 * th
    tx1, ty1 = tcx + 0.5 * tw, tcy + 0.5 * th

    area_s = (sx1 - sx0) * (sy1 - sy0)
    area_t = (tx1 - tx0) * (ty1 - ty0)

    ix0, iy0 = jnp.maximum(sx0, tx0), jnp.maximum(sy0, ty0)
    ix1, iy1 = jnp.minimum(sx1, tx1), jnp.minimum(sy1, ty1)
    inter = jnp.maximum(ix1 - ix0, 0.0) * jnp.maximum(iy1 - iy0, 0.0)
    union = area_s + area_t - inter

    cx0, cy0 = jnp.minimum(sx0, tx0), jnp.minimum(sy0, ty0)
    cx1, cy1 = jnp.maximum(sx1, tx1), jnp.maximum(sy1, ty1)
    carea = jnp.maximum(cx1 - cx0, 0.0) * jnp.maximum(cy1 - cy0, 0.0)

    giou = inter / union - (carea - union) / carea          # [1, NP]
    giou_loss = jnp.sum(1.0 - giou, axis=1, keepdims=True)  # (1, 1)

    lane_out = lax.broadcasted_iota(jnp.int32, (1, 128), 1)
    out_ref[...] = (jnp.where(lane_out == 0, l1, 0.0) +
                    jnp.where(lane_out == 1, giou_loss, 0.0))


def run_box_kernel(src_p, tgt_p):
    NP = src_p.shape[1]
    return pl.pallas_call(
        box_kernel,
        out_shape=jax.ShapeDtypeStruct((1, 128), jnp.float32),
        grid=(1,),
        in_specs=[pl.BlockSpec((8, NP), lambda i: (0, 0)),
                  pl.BlockSpec((8, NP), lambda i: (0, 0))],
        out_specs=pl.BlockSpec((1, 128), lambda i: (0, 0)),
    )(src_p, tgt_p)


# ----------------------------------------------------------------------------
# CustomSetCriterion forward (losses = ['labels', 'boxes'], no aux_outputs)
# ----------------------------------------------------------------------------
@partial(jax.jit, static_argnames=("num_classes", "eos_coef"))
def custom_set_criterion(pred_logits, pred_boxes, tgt_labels, tgt_boxes, *,
                         num_classes, eos_coef):
    B, Q, K = pred_logits.shape
    T = tgt_labels.shape[1]
    assert K == num_classes + 1

    # ---- matcher (Pallas greedy L1 stand-in for Hungarian) ----
    pred_t = jnp.transpose(pred_boxes.astype(jnp.float32), (2, 0, 1))   # [4, B, Q]
    tgt_t = jnp.transpose(tgt_boxes.astype(jnp.float32), (2, 0, 1))     # [4, B, T]
    src_idx = run_matcher(pred_t, tgt_t)                                # [B, T] int32

    # ---- scatter-free index glue ----
    q_iota = jnp.arange(Q, dtype=jnp.int32)
    sel = src_idx[:, :, None] == q_iota[None, None, :]                  # bool [B, T, Q]
    matched = jnp.any(sel, axis=1)                                      # [B, Q]
    tc_m = jnp.sum(jnp.where(sel, tgt_labels[:, :, None], 0), axis=1)   # [B, Q]
    target_classes = jnp.where(matched, tc_m, num_classes).astype(jnp.int32)
    mask = matched.astype(jnp.float32)
    w = jnp.where(target_classes == num_classes,
                  jnp.float32(eos_coef), jnp.float32(1.0))              # empty_weight[tc]

    # matched pred boxes in target order (VPU select + sum; no tiny einsum)
    src_boxes = jnp.sum(
        jnp.where(sel[..., None], pred_boxes.astype(jnp.float32)[:, None, :, :], 0.0),
        axis=2)                                                         # [B, T, 4]
    target_boxes = tgt_boxes.astype(jnp.float32)

    # ---- CE inputs: unpadded [R, K] + packed [R, 8] side-band ----
    R = B * Q
    logits_flat = pred_logits.reshape(R, K).astype(jnp.float32)
    side = jnp.stack([target_classes.reshape(R).astype(jnp.float32),
                      w.reshape(R), mask.reshape(R)], axis=1)           # [R, 3]
    side = jnp.pad(side, ((0, 0), (0, 5)))                              # [R, 8]

    tr = _choose_row_tile(R, K)
    nt = -(-R // tr)
    num_groups = 2 if nt >= 2 else 1    # 2-way "parallel" split (uses both TCs on v7x)
    out_ce = run_ce_kernel(logits_flat, side, R, tr, num_groups)
    ce_tot = out_ce.reshape(num_groups, 8, 128)[:, 0, :].sum(axis=0)    # (128,)

    # ---- box inputs: lane-dense [8, NP]; rows 0..3 = cx, cy, w, h ----
    N = B * T
    NP = max(128, _round_up(N, 128))
    dummy = jnp.array([0.5, 0.5, 0.2, 0.2], jnp.float32)[:, None]       # identical pads -> 0 loss

    def lane_dense(boxes):                                              # [B, T, 4] -> [8, NP]
        x = boxes.reshape(N, 4).T                                       # [4, N]
        if NP > N:
            x = jnp.concatenate([x, jnp.broadcast_to(dummy, (4, NP - N))], axis=1)
        return jnp.concatenate([x, jnp.zeros((4, NP), jnp.float32)], axis=0)

    out_box = run_box_kernel(lane_dense(src_boxes), lane_dense(target_boxes))

    ce_sum, w_sum, correct, matched_n = ce_tot[0], ce_tot[1], ce_tot[2], ce_tot[3]
    l1_sum, giou_sum = out_box[0, 0], out_box[0, 1]

    num_boxes = float(max(B * T, 1))          # world_size == 1, dense targets
    return {
        "loss_ce": ce_sum / w_sum,
        "class_error": 100.0 - 100.0 * correct / matched_n,
        "loss_bbox": l1_sum / num_boxes,
        "loss_giou": giou_sum / num_boxes,
    }


# ----------------------------------------------------------------------------
# Pure-JAX reference (uses an equivalent greedy matcher; checks matcher + losses)
# ----------------------------------------------------------------------------
def greedy_matcher_ref(pred_boxes, tgt_boxes):
    cost = jnp.sum(jnp.abs(pred_boxes[:, :, None, :] - tgt_boxes[:, None, :, :]),
                   axis=-1).astype(jnp.float32)                 # [B, Q, T]
    Q, T = cost.shape[1], cost.shape[2]

    def match_one(c):
        def body(t, carry):
            used, srcs = carry
            col = lax.dynamic_slice_in_dim(c, t, 1, axis=1)[:, 0]
            col = jnp.where(used, jnp.float32(1e30), col)
            q = jnp.argmin(col).astype(jnp.int32)
            return used.at[q].set(True), srcs.at[t].set(q)

        _, srcs = lax.fori_loop(0, T, body,
                                (jnp.zeros((Q,), jnp.bool_), jnp.zeros((T,), jnp.int32)))
        return srcs

    return jax.vmap(match_one)(cost)                            # [B, T]


def reference(pred_logits, pred_boxes, tgt_labels, tgt_boxes, num_classes, eos_coef):
    B, Q, K = pred_logits.shape
    T = tgt_labels.shape[1]
    empty_weight = jnp.ones((K,), jnp.float32).at[-1].set(eos_coef)
    src_idx = greedy_matcher_ref(pred_boxes, tgt_boxes)
    batch_idx = jnp.repeat(jnp.arange(B), T)
    src_flat = src_idx.reshape(-1)
    tgt_flat = jnp.tile(jnp.arange(T), B)
    tco = tgt_labels[batch_idx, tgt_flat]
    tc = jnp.full((B, Q), num_classes, jnp.int32).at[batch_idx, src_flat].set(tco)
    lse = jax.nn.logsumexp(pred_logits, axis=-1)
    logit_y = jnp.take_along_axis(pred_logits, tc[..., None], axis=-1)[..., 0]
    w = empty_weight[tc]
    loss_ce = jnp.sum(w * (lse - logit_y)) / jnp.sum(w)
    pred_cls = jnp.argmax(pred_logits, axis=-1)
    acc = 100.0 * jnp.mean((pred_cls[batch_idx, src_flat] == tco).astype(jnp.float32))
    sb = pred_boxes[batch_idx, src_flat]
    tb = tgt_boxes[batch_idx, tgt_flat]
    num_boxes = float(max(B * T, 1))
    loss_bbox = jnp.sum(jnp.abs(sb - tb)) / num_boxes

    def xyxy(b):
        return jnp.concatenate([b[:, :2] - 0.5 * b[:, 2:], b[:, :2] + 0.5 * b[:, 2:]], -1)

    a, b2 = xyxy(sb), xyxy(tb)
    area_a = (a[:, 2] - a[:, 0]) * (a[:, 3] - a[:, 1])
    area_b = (b2[:, 2] - b2[:, 0]) * (b2[:, 3] - b2[:, 1])
    lt, rb = jnp.maximum(a[:, :2], b2[:, :2]), jnp.minimum(a[:, 2:], b2[:, 2:])
    inter = jnp.prod(jnp.clip(rb - lt, 0.0, None), -1)
    union = area_a + area_b - inter
    ltc, rbc = jnp.minimum(a[:, :2], b2[:, :2]), jnp.maximum(a[:, 2:], b2[:, 2:])
    carea = jnp.prod(jnp.clip(rbc - ltc, 0.0, None), -1)
    giou = inter / union - (carea - union) / carea
    loss_giou = jnp.sum(1.0 - giou) / num_boxes
    return {"loss_ce": loss_ce, "class_error": 100.0 - acc,
            "loss_bbox": loss_bbox, "loss_giou": loss_giou}


if __name__ == "__main__":
    B, Q, T = 2, 8, 3
    num_classes = 6
    eos_coef = 0.1
    K = num_classes + 1

    key = jax.random.PRNGKey(0)
    k1, k2, k3, k4, k5, k6 = jax.random.split(key, 6)

    pred_logits = jax.random.normal(k1, (B, Q, K), jnp.float32)
    pred_ct = jax.random.uniform(k2, (B, Q, 2), minval=0.2, maxval=0.8)
    pred_wh = jax.random.uniform(k3, (B, Q, 2), minval=0.05, maxval=0.3)
    pred_boxes = jnp.concatenate([pred_ct, pred_wh], axis=-1)           # valid cxcywh

    tgt_labels = jax.random.randint(k4, (B, T), 0, num_classes, jnp.int32)
    tgt_ct = jax.random.uniform(k5, (B, T, 2), minval=0.2, maxval=0.8)
    tgt_wh = jax.random.uniform(k6, (B, T, 2), minval=0.05, maxval=0.3)
    tgt_boxes = jnp.concatenate([tgt_ct, tgt_wh], axis=-1)

    losses = custom_set_criterion(pred_logits, pred_boxes, tgt_labels, tgt_boxes,
                                  num_classes=num_classes, eos_coef=eos_coef)
    losses = jax.tree_util.tree_map(jax.block_until_ready, losses)

    ref = reference(pred_logits, pred_boxes, tgt_labels, tgt_boxes,
                    num_classes, eos_coef)
    for name in ("loss_ce", "class_error", "loss_bbox", "loss_giou"):
        np.testing.assert_allclose(np.asarray(losses[name]), np.asarray(ref[name]),
                                   rtol=1e-4, atol=1e-5)

    print("KERNEL_OK")
</pallas_src>

<mosaic_0001>
module attributes {stable_mosaic.version = 11 : i64} {
  func.func @matcher_kernel(%arg0: i32, %arg1: memref<4x2x8xf32, #tpu.memory_space<vmem>>, %arg2: memref<4x2x3xf32, #tpu.memory_space<vmem>>, %arg3: memref<2x3xi32, #tpu.memory_space<vmem>>) attributes {dimension_semantics = [#tpu.dimension_semantics<arbitrary>], iteration_bounds = array<i64: 1>, scalar_prefetch = 0 : i64, scratch_operands = 0 : i64, tpu.core_type = #tpu.core_type<tc>, window_params = [{pipeline_mode = #tpu.pipeline_mode<synchronous>, transform_indices = @transform_0, window_bounds = array<i64: 4, 2, 8>}, {pipeline_mode = #tpu.pipeline_mode<synchronous>, transform_indices = @transform_1, window_bounds = array<i64: 4, 2, 3>}, {pipeline_mode = #tpu.pipeline_mode<synchronous>, transform_indices = @transform_2, window_bounds = array<i64: 2, 3>}]} {
    %c0 = arith.constant 0 : index
    %c0_0 = arith.constant 0 : index
    %c0_1 = arith.constant 0 : index
    %0 = vector.load %arg1[%c0, %c0_0, %c0_1] : memref<4x2x8xf32, #tpu.memory_space<vmem>>, vector<4x2x8xf32>
    %c0_2 = arith.constant 0 : index
    %c0_3 = arith.constant 0 : index
    %c0_4 = arith.constant 0 : index
    %1 = vector.load %arg2[%c0_2, %c0_3, %c0_4] : memref<4x2x3xf32, #tpu.memory_space<vmem>>, vector<4x2x3xf32>
    %cst = arith.constant 0.000000e+00 : f32
    %2 = vector.broadcast %cst : f32 to vector<2x3x8xf32>
    %3 = vector.extract_strided_slice %0 {offsets = [0, 0, 0], sizes = [1, 2, 8], strides = [1, 1, 1]} : vector<4x2x8xf32> to vector<1x2x8xf32>
    %4 = vector.shape_cast %3 : vector<1x2x8xf32> to vector<2x8xf32>
    %5 = vector.shape_cast %4 : vector<2x8xf32> to vector<2x1x8xf32>
    %6 = vector.extract_strided_slice %1 {offsets = [0, 0, 0], sizes = [1, 2, 3], strides = [1, 1, 1]} : vector<4x2x3xf32> to vector<1x2x3xf32>
    %7 = vector.shape_cast %6 : vector<1x2x3xf32> to vector<2x3xf32>
    %8 = vector.shape_cast %7 : vector<2x3xf32> to vector<2x3x1xf32>
    %9 = vector.broadcast %5 : vector<2x1x8xf32> to vector<2x3x8xf32>
    %10 = vector.broadcast %8 : vector<2x3x1xf32> to vector<2x3x8xf32>
    %11 = arith.subf %9, %10 : vector<2x3x8xf32>
    %12 = math.absf %11 : vector<2x3x8xf32>
    %13 = arith.addf %2, %12 : vector<2x3x8xf32>
    %14 = vector.extract_strided_slice %0 {offsets = [1, 0, 0], sizes = [1, 2, 8], strides = [1, 1, 1]} : vector<4x2x8xf32> to vector<1x2x8xf32>
    %15 = vector.shape_cast %14 : vector<1x2x8xf32> to vector<2x8xf32>
    %16 = vector.shape_cast %15 : vector<2x8xf32> to vector<2x1x8xf32>
    %17 = vector.extract_strided_slice %1 {offsets = [1, 0, 0], sizes = [1, 2, 3], strides = [1, 1, 1]} : vector<4x2x3xf32> to vector<1x2x3xf32>
    %18 = vector.shape_cast %17 : vector<1x2x3xf32> to vector<2x3xf32>
    %19 = vector.shape_cast %18 : vector<2x3xf32> to vector<2x3x1xf32>
    %20 = vector.broadcast %16 : vector<2x1x8xf32> to vector<2x3x8xf32>
    %21 = vector.broadcast %19 : vector<2x3x1xf32> to vector<2x3x8xf32>
    %22 = arith.subf %20, %21 : vector<2x3x8xf32>
    %23 = math.absf %22 : vector<2x3x8xf32>
    %24 = arith.addf %13, %23 : vector<2x3x8xf32>
    %25 = vector.extract_strided_slice %0 {offsets = [2, 0, 0], sizes = [1, 2, 8], strides = [1, 1, 1]} : vector<4x2x8xf32> to vector<1x2x8xf32>
    %26 = vector.shape_cast %25 : vector<1x2x8xf32> to vector<2x8xf32>
    %27 = vector.shape_cast %26 : vector<2x8xf32> to vector<2x1x8xf32>
    %28 = vector.extract_strided_slice %1 {offsets = [2, 0, 0], sizes = [1, 2, 3], strides = [1, 1, 1]} : vector<4x2x3xf32> to vector<1x2x3xf32>
    %29 = vector.shape_cast %28 : vector<1x2x3xf32> to vector<2x3xf32>
    %30 = vector.shape_cast %29 : vector<2x3xf32> to vector<2x3x1xf32>
    %31 = vector.broadcast %27 : vector<2x1x8xf32> to vector<2x3x8xf32>
    %32 = vector.broadcast %30 : vector<2x3x1xf32> to vector<2x3x8xf32>
    %33 = arith.subf %31, %32 : vector<2x3x8xf32>
    %34 = math.absf %33 : vector<2x3x8xf32>
    %35 = arith.addf %24, %34 : vector<2x3x8xf32>
    %36 = vector.extract_strided_slice %0 {offsets = [3, 0, 0], sizes = [1, 2, 8], strides = [1, 1, 1]} : vector<4x2x8xf32> to vector<1x2x8xf32>
    %37 = vector.shape_cast %36 : vector<1x2x8xf32> to vector<2x8xf32>
    %38 = vector.shape_cast %37 : vector<2x8xf32> to vector<2x1x8xf32>
    %39 = vector.extract_strided_slice %1 {offsets = [3, 0, 0], sizes = [1, 2, 3], strides = [1, 1, 1]} : vector<4x2x3xf32> to vector<1x2x3xf32>
    %40 = vector.shape_cast %39 : vector<1x2x3xf32> to vector<2x3xf32>
    %41 = vector.shape_cast %40 : vector<2x3xf32> to vector<2x3x1xf32>
    %42 = vector.broadcast %38 : vector<2x1x8xf32> to vector<2x3x8xf32>
    %43 = vector.broadcast %41 : vector<2x3x1xf32> to vector<2x3x8xf32>
    %44 = arith.subf %42, %43 : vector<2x3x8xf32>
    %45 = math.absf %44 : vector<2x3x8xf32>
    %46 = arith.addf %35, %45 : vector<2x3x8xf32>
    %47 = tpu.iota {dimensions = array<i32: 2>} : vector<2x1x8xi32>
    %48 = tpu.iota {dimensions = array<i32: 1>} : vector<2x3x1xi32>
    %49 = tpu.iota {dimensions = array<i32: 1>} : vector<2x3xi32>
    %c0_i32 = arith.constant 0 : i32
    %50 = vector.broadcast %c0_i32 : i32 to vector<2x3xi32>
    %cst_5 = arith.constant 1.000000e+30 : f32
    %c0_i32_6 = arith.constant 0 : i32
    %c3_i32 = arith.constant 3 : i32
    %51 = arith.addi %c0_i32_6, %c3_i32 : i32
    %c1_i32 = arith.constant 1 : i32
    %52:2 = scf.for %arg4 = %c0_i32_6 to %51 step %c1_i32 iter_args(%arg5 = %46, %arg6 = %50) -> (vector<2x3x8xf32>, vector<2x3xi32>)  : i32 {
      %54 = vector.broadcast %arg4 : i32 to vector<2x3x1xi32>
      %55 = arith.cmpi eq, %48, %54 : vector<2x3x1xi32>
      %56 = vector.shape_cast %55 : vector<2x3x1xi1> to vector<2x3x1xi1>
      %57 = vector.broadcast %56 : vector<2x3x1xi1> to vector<2x3x8xi1>
      %58 = vector.broadcast %cst_5 : f32 to vector<2x3x8xf32>
      %59 = arith.select %57, %arg5, %58 : vector<2x3x8xi1>, vector<2x3x8xf32>
      %cst_10 = arith.constant dense<0x7F800000> : vector<2x8xf32>
      %60 = vector.multi_reduction <minimumf>, %59, %cst_10 [1] : vector<2x3x8xf32> to vector<2x8xf32>
      %61 = vector.shape_cast %60 : vector<2x8xf32> to vector<2x1x8xf32>
      %cst_11 = arith.constant dense<0x7F800000> : vector<2x1xf32>
      %62 = vector.multi_reduction <minimumf>, %61, %cst_11 [2] : vector<2x1x8xf32> to vector<2x1xf32>
      %63 = vector.shape_cast %62 : vector<2x1xf32> to vector<2x1x1xf32>
      %64 = vector.broadcast %63 : vector<2x1x1xf32> to vector<2x1x8xf32>
      %65 = arith.cmpf ole, %61, %64 : vector<2x1x8xf32>
      %c8_i32 = arith.constant 8 : i32
      %66 = vector.broadcast %c8_i32 : i32 to vector<2x1x8xi32>
      %67 = arith.select %65, %47, %66 : vector<2x1x8xi1>, vector<2x1x8xi32>
      %cst_12 = arith.constant dense<2147483647> : vector<2x1xi32>
      %68 = vector.multi_reduction <minsi>, %67, %cst_12 [2] : vector<2x1x8xi32> to vector<2x1xi32>
      %69 = vector.broadcast %arg4 : i32 to vector<2x3xi32>
      %70 = arith.cmpi eq, %49, %69 : vector<2x3xi32>
      %71 = vector.shape_cast %68 : vector<2x1xi32> to vector<2x1xi32>
      %72 = vector.broadcast %71 : vector<2x1xi32> to vector<2x3xi32>
      %73 = arith.select %70, %72, %arg6 : vector<2x3xi1>, vector<2x3xi32>
      %74 = vector.shape_cast %68 : vector<2x1xi32> to vector<2x1x1xi32>
      %75 = vector.broadcast %74 : vector<2x1x1xi32> to vector<2x1x8xi32>
      %76 = arith.cmpi eq, %47, %75 : vector<2x1x8xi32>
      %77 = vector.shape_cast %76 : vector<2x1x8xi1> to vector<2x1x8xi1>
      %78 = vector.broadcast %77 : vector<2x1x8xi1> to vector<2x3x8xi1>
      %79 = vector.broadcast %cst_5 : f32 to vector<2x3x8xf32>
      %80 = arith.select %78, %79, %arg5 : vector<2x3x8xi1>, vector<2x3x8xf32>
      scf.yield %80, %73 : vector<2x3x8xf32>, vector<2x3xi32>
    }
    %c3_i32_7 = arith.constant 3 : i32
    %c0_8 = arith.constant 0 : index
    %c0_9 = arith.constant 0 : index
    %53 = vector.load %arg3[%c0_8, %c0_9] : memref<2x3xi32, #tpu.memory_space<vmem>>, vector<2x3xi32>
    tpu.vector_store %arg3[%c0_8, %c0_9], %52#1 {strides = array<i32>} : memref<2x3xi32, #tpu.memory_space<vmem>>, vector<2x3xi32>,
    return
  }
  func.func @transform_0(%arg0: i32) -> (i32, i32, i32) {
    %c0_i32 = arith.constant 0 : i32
    %c0_i32_0 = arith.constant 0 : i32
    %c0_i32_1 = arith.constant 0 : i32
    %c0_i32_2 = arith.constant 0 : i32
    return %c0_i32, %c0_i32_0, %c0_i32_1 : i32, i32, i32
  }
  func.func @transform_1(%arg0: i32) -> (i32, i32, i32) {
    %c0_i32 = arith.constant 0 : i32
    %c0_i32_0 = arith.constant 0 : i32
    %c0_i32_1 = arith.constant 0 : i32
    %c0_i32_2 = arith.constant 0 : i32
    return %c0_i32, %c0_i32_0, %c0_i32_1 : i32, i32, i32
  }
  func.func @transform_2(%arg0: i32) -> (i32, i32) {
    %c0_i32 = arith.constant 0 : i32
    %c0_i32_0 = arith.constant 0 : i32
    %c0_i32_1 = arith.constant 0 : i32
    return %c0_i32, %c0_i32_0 : i32, i32
  }
}

module attributes {stable_mosaic.version = 11 : i64} {
  func.func @box_kernel(%arg0: i32, %arg1: memref<8x128xf32, #tpu.memory_space<vmem>>, %arg2: memref<8x128xf32, #tpu.memory_space<vmem>>, %arg3: memref<1x128xf32, #tpu.memory_space<vmem>>) attributes {dimension_semantics = [#tpu.dimension_semantics<arbitrary>], iteration_bounds = array<i64: 1>, scalar_prefetch = 0 : i64, scratch_operands = 0 : i64, tpu.core_type = #tpu.core_type<tc>, window_params = [{pipeline_mode = #tpu.pipeline_mode<synchronous>, transform_indices = @transform_0, window_bounds = array<i64: 8, 128>}, {pipeline_mode = #tpu.pipeline_mode<synchronous>, transform_indices = @transform_1, window_bounds = array<i64: 8, 128>}, {pipeline_mode = #tpu.pipeline_mode<synchronous>, transform_indices = @transform_2, window_bounds = array<i64: 1, 128>}]} {
    %c0 = arith.constant 0 : index
    %c0_0 = arith.constant 0 : index
    %0 = vector.load %arg1[%c0, %c0_0] : memref<8x128xf32, #tpu.memory_space<vmem>>, vector<8x128xf32>
    %c0_1 = arith.constant 0 : index
    %c0_2 = arith.constant 0 : index
    %1 = vector.load %arg2[%c0_1, %c0_2] : memref<8x128xf32, #tpu.memory_space<vmem>>, vector<8x128xf32>
    %2 = arith.subf %0, %1 : vector<8x128xf32>
    %3 = math.absf %2 : vector<8x128xf32>
    %cst = arith.constant dense<0.000000e+00> : vector<8xf32>
    %4 = vector.multi_reduction <add>, %3, %cst [1] : vector<8x128xf32> to vector<8xf32>
    %5 = vector.shape_cast %4 : vector<8xf32> to vector<8x1xf32>
    %cst_3 = arith.constant dense<0.000000e+00> : vector<1xf32>
    %6 = vector.multi_reduction <add>, %5, %cst_3 [0] : vector<8x1xf32> to vector<1xf32>
    %7 = vector.shape_cast %6 : vector<1xf32> to vector<1x1xf32>
    %8 = vector.extract_strided_slice %0 {offsets = [0, 0], sizes = [1, 128], strides = [1, 1]} : vector<8x128xf32> to vector<1x128xf32>
    %9 = vector.extract_strided_slice %0 {offsets = [1, 0], sizes = [1, 128], strides = [1, 1]} : vector<8x128xf32> to vector<1x128xf32>
    %10 = vector.extract_strided_slice %0 {offsets = [2, 0], sizes = [1, 128], strides = [1, 1]} : vector<8x128xf32> to vector<1x128xf32>
    %11 = vector.extract_strided_slice %0 {offsets = [3, 0], sizes = [1, 128], strides = [1, 1]} : vector<8x128xf32> to vector<1x128xf32>
    %12 = vector.extract_strided_slice %1 {offsets = [0, 0], sizes = [1, 128], strides = [1, 1]} : vector<8x128xf32> to vector<1x128xf32>
    %13 = vector.extract_strided_slice %1 {offsets = [1, 0], sizes = [1, 128], strides = [1, 1]} : vector<8x128xf32> to vector<1x128xf32>
    %14 = vector.extract_strided_slice %1 {offsets = [2, 0], sizes = [1, 128], strides = [1, 1]} : vector<8x128xf32> to vector<1x128xf32>
    %15 = vector.extract_strided_slice %1 {offsets = [3, 0], sizes = [1, 128], strides = [1, 1]} : vector<8x128xf32> to vector<1x128xf32>
    %cst_4 = arith.constant 5.000000e-01 : f32
    %16 = vector.broadcast %cst_4 : f32 to vector<1x128xf32>
    %17 = arith.mulf %16, %10 : vector<1x128xf32>
    %18 = arith.subf %8, %17 : vector<1x128xf32>
    %cst_5 = arith.constant 5.000000e-01 : f32
    %19 = vector.broadcast %cst_5 : f32 to vector<1x128xf32>
    %20 = arith.mulf %19, %11 : vector<1x128xf32>
    %21 = arith.subf %9, %20 : vector<1x128xf32>
    %cst_6 = arith.constant 5.000000e-01 : f32
    %22 = vector.broadcast %cst_6 : f32 to vector<1x128xf32>
    %23 = arith.mulf %22, %10 : vector<1x128xf32>
    %24 = arith.addf %8, %23 : vector<1x128xf32>
    %cst_7 = arith.constant 5.000000e-01 : f32
    %25 = vector.broadcast %cst_7 : f32 to vector<1x128xf32>
    %26 = arith.mulf %25, %11 : vector<1x128xf32>
    %27 = arith.addf %9, %26 : vector<1x128xf32>
    %cst_8 = arith.constant 5.000000e-01 : f32
    %28 = vector.broadcast %cst_8 : f32 to vector<1x128xf32>
    %29 = arith.mulf %28, %14 : vector<1x128xf32>
    %30 = arith.subf %12, %29 : vector<1x128xf32>
    %cst_9 = arith.constant 5.000000e-01 : f32
    %31 = vector.broadcast %cst_9 : f32 to vector<1x128xf32>
    %32 = arith.mulf %31, %15 : vector<1x128xf32>
    %33 = arith.subf %13, %32 : vector<1x128xf32>
    %cst_10 = arith.constant 5.000000e-01 : f32
    %34 = vector.broadcast %cst_10 : f32 to vector<1x128xf32>
    %35 = arith.mulf %34, %14 : vector<1x128xf32>
    %36 = arith.addf %12, %35 : vector<1x128xf32>
    %cst_11 = arith.constant 5.000000e-01 : f32
    %37 = vector.broadcast %cst_11 : f32 to vector<1x128xf32>
    %38 = arith.mulf %37, %15 : vector<1x128xf32>
    %39 = arith.addf %13, %38 : vector<1x128xf32>
    %40 = arith.subf %24, %18 : vector<1x128xf32>
    %41 = arith.subf %27, %21 : vector<1x128xf32>
    %42 = arith.mulf %40, %41 : vector<1x128xf32>
    %43 = arith.subf %36, %30 : vector<1x128xf32>
    %44 = arith.subf %39, %33 : vector<1x128xf32>
    %45 = arith.mulf %43, %44 : vector<1x128xf32>
    %46 = arith.maximumf %18, %30 : vector<1x128xf32>
    %47 = arith.maximumf %21, %33 : vector<1x128xf32>
    %48 = arith.minimumf %24, %36 : vector<1x128xf32>
    %49 = arith.minimumf %27, %39 : vector<1x128xf32>
    %50 = arith.subf %48, %46 : vector<1x128xf32>
    %cst_12 = arith.constant 0.000000e+00 : f32
    %51 = vector.broadcast %cst_12 : f32 to vector<1x128xf32>
    %52 = arith.maximumf %50, %51 : vector<1x128xf32>
    %53 = arith.subf %49, %47 : vector<1x128xf32>
    %cst_13 = arith.constant 0.000000e+00 : f32
    %54 = vector.broadcast %cst_13 : f32 to vector<1x128xf32>
    %55 = arith.maximumf %53, %54 : vector<1x128xf32>
    %56 = arith.mulf %52, %55 : vector<1x128xf32>
    %57 = arith.addf %42, %45 : vector<1x128xf32>
    %58 = arith.subf %57, %56 : vector<1x128xf32>
    %59 = arith.minimumf %18, %30 : vector<1x128xf32>
    %60 = arith.minimumf %21, %33 : vector<1x128xf32>
    %61 = arith.maximumf %24, %36 : vector<1x128xf32>
    %62 = arith.maximumf %27, %39 : vector<1x128xf32>
    %63 = arith.subf %61, %59 : vector<1x128xf32>
    %cst_14 = arith.constant 0.000000e+00 : f32
    %64 = vector.broadcast %cst_14 : f32 to vector<1x128xf32>
    %65 = arith.maximumf %63, %64 : vector<1x128xf32>
    %66 = arith.subf %62, %60 : vector<1x128xf32>
    %cst_15 = arith.constant 0.000000e+00 : f32
    %67 = vector.broadcast %cst_15 : f32 to vector<1x128xf32>
    %68 = arith.maximumf %66, %67 : vector<1x128xf32>
    %69 = arith.mulf %65, %68 : vector<1x128xf32>
    %70 = arith.divf %56, %58 : vector<1x128xf32>
    %71 = arith.subf %69, %58 : vector<1x128xf32>
    %72 = arith.divf %71, %69 : vector<1x128xf32>
    %73 = arith.subf %70, %72 : vector<1x128xf32>
    %cst_16 = arith.constant 1.000000e+00 : f32
    %74 = vector.broadcast %cst_16 : f32 to vector<1x128xf32>
    %75 = arith.subf %74, %73 : vector<1x128xf32>
    %cst_17 = arith.constant dense<0.000000e+00> : vector<1xf32>
    %76 = vector.multi_reduction <add>, %75, %cst_17 [1] : vector<1x128xf32> to vector<1xf32>
    %77 = vector.shape_cast %76 : vector<1xf32> to vector<1x1xf32>
    %78 = tpu.iota {dimensions = array<i32: 1>} : vector<1x128xi32>
    %c0_i32 = arith.constant 0 : i32
    %79 = vector.broadcast %c0_i32 : i32 to vector<1x128xi32>
    %80 = arith.cmpi eq, %78, %79 : vector<1x128xi32>
    %cst_18 = arith.constant 0.000000e+00 : f32
    %81 = vector.shape_cast %7 : vector<1x1xf32> to vector<1x1xf32>
    %82 = vector.broadcast %81 : vector<1x1xf32> to vector<1x128xf32>
    %83 = vector.broadcast %cst_18 : f32 to vector<1x128xf32>
    %84 = arith.select %80, %82, %83 : vector<1x128xi1>, vector<1x128xf32>
    %c1_i32 = arith.constant 1 : i32
    %85 = vector.broadcast %c1_i32 : i32 to vector<1x128xi32>
    %86 = arith.cmpi eq, %78, %85 : vector<1x128xi32>
    %cst_19 = arith.constant 0.000000e+00 : f32
    %87 = vector.shape_cast %77 : vector<1x1xf32> to vector<1x1xf32>
    %88 = vector.broadcast %87 : vector<1x1xf32> to vector<1x128xf32>
    %89 = vector.broadcast %cst_19 : f32 to vector<1x128xf32>
    %90 = arith.select %86, %88, %89 : vector<1x128xi1>, vector<1x128xf32>
    %91 = arith.addf %84, %90 : vector<1x128xf32>
    %c0_20 = arith.constant 0 : index
    %c0_21 = arith.constant 0 : index
    %92 = vector.load %arg3[%c0_20, %c0_21] : memref<1x128xf32, #tpu.memory_space<vmem>>, vector<1x128xf32>
    tpu.vector_store %arg3[%c0_20, %c0_21], %91 {strides = array<i32>} : memref<1x128xf32, #tpu.memory_space<vmem>>, vector<1x128xf32>,
    return
  }
  func.func @transform_0(%arg0: i32) -> (i32, i32) {
    %c0_i32 = arith.constant 0 : i32
    %c0_i32_0 = arith.constant 0 : i32
    %c0_i32_1 = arith.constant 0 : i32
    return %c0_i32, %c0_i32_0 : i32, i32
  }
  func.func @transform_1(%arg0: i32) -> (i32, i32) {
    %c0_i32 = arith.constant 0 : i32
    %c0_i32_0 = arith.constant 0 : i32
    %c0_i32_1 = arith.constant 0 : i32
    return %c0_i32, %c0_i32_0 : i32, i32
  }
  func.func @transform_2(%arg0: i32) -> (i32, i32) {
    %c0_i32 = arith.constant 0 : i32
    %c0_i32_0 = arith.constant 0 : i32
    %c0_i32_1 = arith.constant 0 : i32
    return %c0_i32, %c0_i32_0 : i32, i32
  }
}

module attributes {stable_mosaic.version = 11 : i64} {
  func.func @ce_kernel(%arg0: i32, %arg1: i32, %arg2: memref<16x7xf32, #tpu.memory_space<vmem>>, %arg3: memref<16x8xf32, #tpu.memory_space<vmem>>, %arg4: memref<8x128xf32, #tpu.memory_space<vmem>>) attributes {dimension_semantics = [#tpu.dimension_semantics<parallel>, #tpu.dimension_semantics<arbitrary>], iteration_bounds = array<i64: 1, 1>, scalar_prefetch = 0 : i64, scratch_operands = 0 : i64, tpu.core_type = #tpu.core_type<tc>, window_params = [{transform_indices = @transform_0, window_bounds = array<i64: 16, 7>}, {transform_indices = @transform_1, window_bounds = array<i64: 16, 8>}, {transform_indices = @transform_2, window_bounds = array<i64: 8, 128>}]} {
    %c0_i32 = arith.constant 0 : i32
    %0 = arith.cmpi eq, %arg1, %c0_i32 : i32
    %1 = arith.extui %0 : i1 to i32
    %c0_i32_0 = arith.constant 0 : i32
    %2 = arith.cmpi ne, %1, %c0_i32_0 : i32
    scf.if %2 {
      %cst_27 = arith.constant 0.000000e+00 : f32
      %95 = vector.broadcast %cst_27 : f32 to vector<8x128xf32>
      %c0_28 = arith.constant 0 : index
      %c0_29 = arith.constant 0 : index
      %96 = vector.load %arg4[%c0_28, %c0_29] : memref<8x128xf32, #tpu.memory_space<vmem>>, vector<8x128xf32>
      tpu.vector_store %arg4[%c0_28, %c0_29], %95 {strides = array<i32>} : memref<8x128xf32, #tpu.memory_space<vmem>>, vector<8x128xf32>,
    } else {
    }
    %c0 = arith.constant 0 : index
    %c0_1 = arith.constant 0 : index
    %3 = vector.load %arg2[%c0, %c0_1] : memref<16x7xf32, #tpu.memory_space<vmem>>, vector<16x7xf32>
    %c0_2 = arith.constant 0 : index
    %c0_3 = arith.constant 0 : index
    %4 = vector.load %arg3[%c0_2, %c0_3] : memref<16x8xf32, #tpu.memory_space<vmem>>, vector<16x8xf32>
    %c1_i32 = arith.constant 1 : i32
    %5 = arith.muli %arg0, %c1_i32 : i32
    %6 = arith.addi %5, %arg1 : i32
    %7 = tpu.iota {dimensions = array<i32: 0>} : vector<16x1xi32>
    %c16_i32 = arith.constant 16 : i32
    %8 = arith.muli %6, %c16_i32 : i32
    %9 = vector.broadcast %8 : i32 to vector<16x1xi32>
    %10 = arith.addi %7, %9 : vector<16x1xi32>
    %c16_i32_4 = arith.constant 16 : i32
    %11 = vector.broadcast %c16_i32_4 : i32 to vector<16x1xi32>
    %12 = arith.cmpi slt, %10, %11 : vector<16x1xi32>
    %13 = vector.extract_strided_slice %4 {offsets = [0, 0], sizes = [16, 1], strides = [1, 1]} : vector<16x8xf32> to vector<16x1xf32>
    %cst = arith.constant 0.000000e+00 : f32
    %14 = vector.broadcast %cst : f32 to vector<16x1xf32>
    %15 = arith.select %12, %13, %14 : vector<16x1xi1>, vector<16x1xf32>
    %16 = arith.fptosi %15 : vector<16x1xf32> to vector<16x1xi32>
    %17 = vector.extract_strided_slice %4 {offsets = [0, 1], sizes = [16, 1], strides = [1, 1]} : vector<16x8xf32> to vector<16x1xf32>
    %cst_5 = arith.constant 0.000000e+00 : f32
    %18 = vector.broadcast %cst_5 : f32 to vector<16x1xf32>
    %19 = arith.select %12, %17, %18 : vector<16x1xi1>, vector<16x1xf32>
    %20 = vector.extract_strided_slice %4 {offsets = [0, 2], sizes = [16, 1], strides = [1, 1]} : vector<16x8xf32> to vector<16x1xf32>
    %cst_6 = arith.constant 0.000000e+00 : f32
    %21 = vector.broadcast %cst_6 : f32 to vector<16x1xf32>
    %22 = arith.select %12, %20, %21 : vector<16x1xi1>, vector<16x1xf32>
    %cst_7 = arith.constant 0.000000e+00 : f32
    %23 = vector.shape_cast %12 : vector<16x1xi1> to vector<16x1xi1>
    %24 = vector.broadcast %23 : vector<16x1xi1> to vector<16x7xi1>
    %25 = vector.broadcast %cst_7 : f32 to vector<16x7xf32>
    %26 = arith.select %24, %3, %25 : vector<16x7xi1>, vector<16x7xf32>
    %27 = tpu.iota {dimensions = array<i32: 1>} : vector<16x7xi32>
    %28 = vector.broadcast %16 : vector<16x1xi32> to vector<16x7xi32>
    %29 = arith.cmpi eq, %27, %28 : vector<16x7xi32>
    %cst_8 = arith.constant dense<0xFF800000> : vector<16xf32>
    %30 = vector.multi_reduction <maximumf>, %26, %cst_8 [1] : vector<16x7xf32> to vector<16xf32>
    %31 = vector.shape_cast %30 : vector<16xf32> to vector<16x1xf32>
    %32 = vector.broadcast %31 : vector<16x1xf32> to vector<16x7xf32>
    %33 = arith.subf %26, %32 : vector<16x7xf32>
    %34 = math.exp %33 : vector<16x7xf32>
    %cst_9 = arith.constant dense<0.000000e+00> : vector<16xf32>
    %35 = vector.multi_reduction <add>, %34, %cst_9 [1] : vector<16x7xf32> to vector<16xf32>
    %36 = vector.shape_cast %35 : vector<16xf32> to vector<16x1xf32>
    %37 = math.log %36 : vector<16x1xf32>
    %38 = arith.addf %31, %37 : vector<16x1xf32>
    %cst_10 = arith.constant 0.000000e+00 : f32
    %39 = vector.broadcast %cst_10 : f32 to vector<16x7xf32>
    %40 = arith.select %29, %26, %39 : vector<16x7xi1>, vector<16x7xf32>
    %cst_11 = arith.constant dense<0.000000e+00> : vector<16xf32>
    %41 = vector.multi_reduction <add>, %40, %cst_11 [1] : vector<16x7xf32> to vector<16xf32>
    %42 = vector.shape_cast %41 : vector<16xf32> to vector<16x1xf32>
    %43 = arith.subf %38, %42 : vector<16x1xf32>
    %44 = arith.mulf %19, %43 : vector<16x1xf32>
    %45 = vector.broadcast %31 : vector<16x1xf32> to vector<16x7xf32>
    %46 = arith.cmpf oge, %26, %45 : vector<16x7xf32>
    %c7_i32 = arith.constant 7 : i32
    %47 = vector.broadcast %c7_i32 : i32 to vector<16x7xi32>
    %48 = arith.select %46, %27, %47 : vector<16x7xi1>, vector<16x7xi32>
    %cst_12 = arith.constant dense<2147483647> : vector<16xi32>
    %49 = vector.multi_reduction <minsi>, %48, %cst_12 [1] : vector<16x7xi32> to vector<16xi32>
    %50 = vector.shape_cast %49 : vector<16xi32> to vector<16x1xi32>
    %51 = arith.cmpi eq, %50, %16 : vector<16x1xi32>
    %52 = arith.extui %51 : vector<16x1xi1> to vector<16x1xi32>
    %53 = arith.sitofp %52 : vector<16x1xi32> to vector<16x1xf32>
    %54 = arith.mulf %22, %53 : vector<16x1xf32>
    %55 = tpu.iota {dimensions = array<i32: 1>} : vector<1x128xi32>
    %c0_13 = arith.constant 0 : index
    %c0_14 = arith.constant 0 : index
    %56 = vector.load %arg4[%c0_13, %c0_14] : memref<8x128xf32, #tpu.memory_space<vmem>>, vector<8x128xf32>
    %cst_15 = arith.constant dense<0.000000e+00> : vector<1xf32>
    %57 = vector.multi_reduction <add>, %44, %cst_15 [0] : vector<16x1xf32> to vector<1xf32>
    %58 = vector.shape_cast %57 : vector<1xf32> to vector<1x1xf32>
    %c0_i32_16 = arith.constant 0 : i32
    %59 = vector.broadcast %c0_i32_16 : i32 to vector<1x128xi32>
    %60 = arith.cmpi eq, %55, %59 : vector<1x128xi32>
    %cst_17 = arith.constant 0.000000e+00 : f32
    %61 = vector.shape_cast %58 : vector<1x1xf32> to vector<1x1xf32>
    %62 = vector.broadcast %61 : vector<1x1xf32> to vector<1x128xf32>
    %63 = vector.broadcast %cst_17 : f32 to vector<1x128xf32>
    %64 = arith.select %60, %62, %63 : vector<1x128xi1>, vector<1x128xf32>
    %cst_18 = arith.constant dense<0.000000e+00> : vector<1xf32>
    %65 = vector.multi_reduction <add>, %19, %cst_18 [0] : vector<16x1xf32> to vector<1xf32>
    %66 = vector.shape_cast %65 : vector<1xf32> to vector<1x1xf32>
    %c1_i32_19 = arith.constant 1 : i32
    %67 = vector.broadcast %c1_i32_19 : i32 to vector<1x128xi32>
    %68 = arith.cmpi eq, %55, %67 : vector<1x128xi32>
    %cst_20 = arith.constant 0.000000e+00 : f32
    %69 = vector.shape_cast %66 : vector<1x1xf32> to vector<1x1xf32>
    %70 = vector.broadcast %69 : vector<1x1xf32> to vector<1x128xf32>
    %71 = vector.broadcast %cst_20 : f32 to vector<1x128xf32>
    %72 = arith.select %68, %70, %71 : vector<1x128xi1>, vector<1x128xf32>
    %73 = arith.addf %64, %72 : vector<1x128xf32>
    %cst_21 = arith.constant dense<0.000000e+00> : vector<1xf32>
    %74 = vector.multi_reduction <add>, %54, %cst_21 [0] : vector<16x1xf32> to vector<1xf32>
    %75 = vector.shape_cast %74 : vector<1xf32> to vector<1x1xf32>
    %c2_i32 = arith.constant 2 : i32
    %76 = vector.broadcast %c2_i32 : i32 to vector<1x128xi32>
    %77 = arith.cmpi eq, %55, %76 : vector<1x128xi32>
    %cst_22 = arith.constant 0.000000e+00 : f32
    %78 = vector.shape_cast %75 : vector<1x1xf32> to vector<1x1xf32>
    %79 = vector.broadcast %78 : vector<1x1xf32> to vector<1x128xf32>
    %80 = vector.broadcast %cst_22 : f32 to vector<1x128xf32>
    %81 = arith.select %77, %79, %80 : vector<1x128xi1>, vector<1x128xf32>
    %82 = arith.addf %73, %81 : vector<1x128xf32>
    %cst_23 = arith.constant dense<0.000000e+00> : vector<1xf32>
    %83 = vector.multi_reduction <add>, %22, %cst_23 [0] : vector<16x1xf32> to vector<1xf32>
    %84 = vector.shape_cast %83 : vector<1xf32> to vector<1x1xf32>
    %c3_i32 = arith.constant 3 : i32
    %85 = vector.broadcast %c3_i32 : i32 to vector<1x128xi32>
    %86 = arith.cmpi eq, %55, %85 : vector<1x128xi32>
    %cst_24 = arith.constant 0.000000e+00 : f32
    %87 = vector.shape_cast %84 : vector<1x1xf32> to vector<1x1xf32>
    %88 = vector.broadcast %87 : vector<1x1xf32> to vector<1x128xf32>
    %89 = vector.broadcast %cst_24 : f32 to vector<1x128xf32>
    %90 = arith.select %86, %88, %89 : vector<1x128xi1>, vector<1x128xf32>
    %91 = arith.addf %82, %90 : vector<1x128xf32>
    %92 = vector.broadcast %91 : vector<1x128xf32> to vector<8x128xf32>
    %93 = arith.addf %56, %92 : vector<8x128xf32>
    %c0_25 = arith.constant 0 : index
    %c0_26 = arith.constant 0 : index
    %94 = vector.load %arg4[%c0_25, %c0_26] : memref<8x128xf32, #tpu.memory_space<vmem>>, vector<8x128xf32>
    tpu.vector_store %arg4[%c0_25, %c0_26], %93 {strides = array<i32>} : memref<8x128xf32, #tpu.memory_space<vmem>>, vector<8x128xf32>,
    return
  }
  func.func @transform_0(%arg0: i32, %arg1: i32) -> (i32, i32) {
    %c1_i32 = arith.constant 1 : i32
    %0 = arith.muli %arg0, %c1_i32 : i32
    %1 = arith.addi %0, %arg1 : i32
    %c0_i32 = arith.constant 0 : i32
    %2 = arith.minsi %1, %c0_i32 : i32
    %c0_i32_0 = arith.constant 0 : i32
    %c0_i32_1 = arith.constant 0 : i32
    return %2, %c0_i32_0 : i32, i32
  }
  func.func @transform_1(%arg0: i32, %arg1: i32) -> (i32, i32) {
    %c1_i32 = arith.constant 1 : i32
    %0 = arith.muli %arg0, %c1_i32 : i32
    %1 = arith.addi %0, %arg1 : i32
    %c0_i32 = arith.constant 0 : i32
    %2 = arith.minsi %1, %c0_i32 : i32
    %c0_i32_0 = arith.constant 0 : i32
    %c0_i32_1 = arith.constant 0 : i32
    return %2, %c0_i32_0 : i32, i32
  }
  func.func @transform_2(%arg0: i32, %arg1: i32) -> (i32, i32) {
    %c0_i32 = arith.constant 0 : i32
    %c0_i32_0 = arith.constant 0 : i32
    return %arg0, %c0_i32 : i32, i32
  }
}

</mosaic_0001>

<bundles_post_ra>
// kernel: custom_set_criterion.5
= control target key start
LH: loop header
LB: loop body
LE: loop exit
PB: predicated region body
PF: predicated region fallthrough
CT: control target
= control target key end

     0   :  { %vm96_vm8 = vcmask 1040384   ;;  %v100_v63 = vlaneseq  ;;  %s140_s0 = inlined_call_operand.vmem [shape: f32[8,128], index: 0, kind: input, shape index: {}]   ;;  %s141_s1 = inlined_call_operand.vmem [shape: f32[8,128], index: 1, kind: input, shape index: {}]   ;;  %s142_s2 = inlined_call_operand.vmem [shape: f32[1,128], index: 2, kind: output, shape index: {}]  }
   0x1   :  { %v11_v0 = vld [vmem:[%s140_s0] sm:$0xff] }
   0x2   :  { %v12_v1 = vld [vmem:[%s141_s1] sm:$0xff]  ;;  %v23_v3 = vmul.f32 0.5, %v11_v0 }
   0x3   :  { %v13_v2 = vsub.f32 %v11_v0, %v12_v1  ;;  %v29_v4 = vmul.f32 0.5, %v12_v1 }
   0x4   :  { %v25_v6 = vrot.slane %v23_v3, 2 }
   0x5   :  { %v14_v5 = vand.u32 2147483647, %v13_v2  ;;  %v31_v7 = vrot.slane %v29_v4, 2 }
   0x6   :  { %v27_v8 = vsub.f32 %v11_v0, %v25_v6  ;;  %v28_v9 = vadd.f32 %v25_v6, %v11_v0 }
   0x7   :  { %v33_v10 = vsub.f32 %v12_v1, %v31_v7  ;;  %v34_v11 = vadd.f32 %v31_v7, %v12_v1  ;;  %15 = vadd.xlane.f32.xlu0 %v14_v5  ;;  %v101_v1 = vand.u32 127, %v100_v63 }
   0x8   :  { %v35_v12 = vsub.f32 %v28_v9, %v27_v8 }
   0x9   :  { %v40_v13 = vsub.f32 %v34_v11, %v33_v10  ;;  %v55_v14 = vmin.f32 %v27_v8, %v33_v10  ;;  %v56_v15 = vmax.f32 %v28_v9, %v34_v11  ;;  %v45_v16 = vmax.f32 %v27_v8, %v33_v10 }
   0xa   :  { %v46_v17 = vmin.f32 %v28_v9, %v34_v11  ;;  %v37_v19 = vrot.slane %v35_v12, 1  ;;  %vm102_vm9 = vcmp.eq.s32.totalorder %v101_v1, 0  ;;  %vm104_vm10 = vcmp.eq.s32.totalorder %v101_v1, 1 }
   0xb   :  { %v57_v18 = vsub.f32 %v56_v15, %v55_v14  ;;  %v42_v20 = vrot.slane %v40_v13, 1 }
   0xc   :  { %v47_v21 = vsub.f32 %v46_v17, %v45_v16  ;;  %v39_v23 = vmul.f32 %v37_v19, %v35_v12 }
   0xd   :  { %v58_v22 = vmax.f32 %v57_v18, 0.0  ;;  %v44_v24 = vmul.f32 %v42_v20, %v40_v13 }
   0xe   :  { %v48_v25 = vmax.f32 %v47_v21, 0.0 }
   0xf   :  { %v60_v26 = vrot.slane %v58_v22, 1  ;;  %v53_v28 = vadd.f32 %v44_v24, %v39_v23 }
  0x10   :  { %v50_v27 = vrot.slane %v48_v25, 1 }
  0x11   :  { %v62_v29 = vmul.f32 %v60_v26, %v58_v22 }
  0x12   :  { %v52_v30 = vmul.f32 %v50_v27, %v48_v25 }
  0x13   :  { %112 = vrcp.f32 %v62_v29  ;;  %v90_v34 = vand.u32 2147483648, %v62_v29  ;;  %vm84_vm0 = vweird.f32 %v62_v29  ;;  %v88_v37 = vand.u32 2147483647, %v62_v29 }
  0x14   :  { %v54_v31 = vsub.f32 %v53_v28, %v52_v30 }
  0x15   :  { %v91_v41 = vor.u32 1.1754944e-38, %v90_v34  ;;  %vm89_vm5 = vcmp.eq.f32.partialorder %v88_v37, 8.507059e+37 }
  0x16   :  { %114 = vrcp.f32 %v54_v31  ;;  %v74_v39 = vand.u32 2147483648, %v54_v31  ;;  %vm68_vm2 = vweird.f32 %v54_v31  ;;  %v72_v43 = vand.u32 2147483647, %v54_v31 }
  0x17   :  { %v78_v46 = vsub.f32 %v62_v29, %v54_v31 }
  0x18   :  { %v75_v47 = vor.u32 1.1754944e-38, %v74_v39  ;;  %vm73_vm7 = vcmp.eq.f32.partialorder %v72_v43, 8.507059e+37 }
  0x19   :  { %v113_v32 = vpop.eup %112 }
  0x1a   :  { %v80_v33 = vmul.f32 %v113_v32, %v62_v29  ;;  %vm85_vm1 = vweird.f32 %v113_v32 }
  0x1b   :  { %vm86_vm4 = vmor %vm84_vm0, %vm85_vm1 }
  0x1c   :  { %v115_v35 = vpop.eup %114  ;;  %v81_v36 = vsub.f32 1.0, %v80_v33 }
  0x1d   :  { %v64_v38 = vmul.f32 %v115_v35, %v54_v31  ;;  %vm69_vm3 = vweird.f32 %v115_v35 }
  0x1e   :  { %v82_v40 = vmul.f32 %v113_v32, %v81_v36  ;;  %vm70_vm6 = vmor %vm68_vm2, %vm69_vm3 }
  0x1f   :  { %v65_v42 = vsub.f32 1.0, %v64_v38 }
  0x20   :  { %v83_v44 = vadd.f32 %v113_v32, %v82_v40 }
  0x21   :  { %v66_v45 = vmul.f32 %v115_v35, %v65_v42 }
  0x22   :  { %v87_v48 = vsel %vm86_vm4, %v113_v32, %v83_v44 }
  0x23   :  { %v67_v49 = vadd.f32 %v115_v35, %v66_v45  ;;  %v92_v50 = vsel %vm89_vm5, %v91_v41, %v87_v48 }
  0x24   :  { %v93_v52 = vmul.f32 %v92_v50, %v78_v46 }
  0x25   :  { %v71_v51 = vsel %vm70_vm6, %v115_v35, %v67_v49 }
  0x26   :  { %v76_v53 = vsel %vm73_vm7, %v75_v47, %v71_v51 }
  0x27   :  { %v77_v54 = vmul.f32 %v76_v53, %v52_v30 }
  0x29   :  { %v94_v55 = vsub.f32 %v77_v54, %v93_v52 }
  0x2b   :  { %v95_v56 = vsub.f32 1.0, %v94_v55 }
  0x2d   :  { %v97_v57 = vsel %vm96_vm8, %v95_v56, 0.0 }
  0x2e   :  { %98 = vadd.xlane.f32.xlu0 %v97_v57 }
  0x7a   :  { %v16_v58 = vpop.xlane.xlu0 %15 }
  0x7b   :  { %v17_v59 = vrot.slane %v16_v58, 4 }
  0x7d   :  { %v18_v60 = vadd.f32 %v17_v59, %v16_v58 }
  0x7f   :  { %v19_v61 = vrot.slane %v18_v60, 2 }
  0x81   :  { %v20_v62 = vadd.f32 %v19_v61, %v18_v60 }
  0x83   :  { %v21_v0 = vrot.slane %v20_v62, 1 }
  0x85   :  { %v22_v2 = vadd.f32 %v21_v0, %v20_v62 }
  0x87   :  { %v103_v4 = vsel %vm102_vm9, %v22_v2, 0.0 }
  0xa1   :  { %v99_v3 = vpop.xlane.xlu0 %98 }
  0xa2   :  { %v105_v5 = vsel %vm104_vm10, %v99_v3, 0.0 }
  0xa3   :  { %v106_v6 = vadd.f32 %v105_v5, %v103_v4 }
  0xa5   :  { %107 = vst [vmem:[%s142_s2] sm:$0x1] %v106_v6 }

// kernel: custom_set_criterion.3
= control target key start
LH: loop header
LB: loop body
LE: loop exit
PB: predicated region body
PF: predicated region fallthrough
CT: control target
= control target key end

     0   :  { %v22_v0 = vlaneseq  ;;  %v343_v61 = vmov 0   ;;  %s387_s1 = inlined_call_operand.vmem [shape: f32[4,2,3], index: 1, kind: input, shape index: {}]   ;;  %s388_s2 = inlined_call_operand.vmem [shape: s32[2,3], index: 2, kind: output, shape index: {}]   ;;  %s389_s0 = inlined_call_operand.vmem [shape: f32[4,2,8], index: 0, kind: input, shape index: {}]  }
   0x1   :  { %v16_v3 = vld [vmem:[%s387_s1 + $0x2] sm:$0x3]  ;;  %v15_v4 = vld [vmem:[%s387_s1] sm:$0x3]  ;;  %v17_v5 = vld [vmem:[%s387_s1 + $0x4] sm:$0x3] }
   0x2   :  { %v312_v1 = vshrl.u32 %v22_v0, 7  ;;  %v314_v2 = vand.u32 127, %v22_v0  ;;  %v47_v6 = vperm.slane %v16_v3, 0  ;;  %v21_v7 = vperm.slane %v15_v4, 0  ;;  %v18_v12 = vld [vmem:[%s387_s1 + $0x6] sm:$0x3] }
   0x3   :  { %v73_v8 = vperm.slane %v17_v5, 0  ;;  %v54_v9 = vperm.slane %v16_v3, 1  ;;  %v28_v10 = vperm.slane %v15_v4, 1  ;;  %v80_v11 = vperm.slane %v17_v5, 1  ;;  %v12_v16 = vld [vmem:[%s389_s0 + $0x2] sm:$0x3] }
   0x4   :  { %263 = vset.pattern.permute.xlu1 %v312_v1  ;;  %262 = vset.pattern.permute.xlu0 %v312_v1  ;;  %v106_v13 = vperm.slane %v18_v12, 1  ;;  %v99_v14 = vperm.slane %v18_v12, 0  ;;  %v11_v19 = vld [vmem:[%s389_s0] sm:$0x3]  ;;  %v46_v20 = vrot.slane %v12_v16, 1  ;;  %v61_v22 = vperm.slane %v12_v16, 0 }
   0x5   :  { %264 = vset.pattern.permute.xlu2 %v312_v1  ;;  %v20_v21 = vrot.slane %v11_v19, 1  ;;  %v35_v23 = vperm.slane %v11_v19, 0  ;;  %v13_v24 = vld [vmem:[%s389_s0 + $0x4] sm:$0x3]  ;;  %v14_v29 = vld [vmem:[%s389_s0 + $0x6] sm:$0x3] }
   0x6   :  { %v72_v25 = vrot.slane %v13_v24, 1  ;;  %v62_v26 = vperm.slane %v46_v20, 0  ;;  %v87_v30 = vperm.slane %v13_v24, 0  ;;  %v98_v37 = vrot.slane %v14_v29, 1  ;;  %s349_s0 = smov 0  }
   0x7   :  { %v36_v27 = vperm.slane %v20_v21, 0  ;;  %v113_v46 = vperm.slane %v14_v29, 0 }
   0x8   :  { %v88_v34 = vperm.slane %v72_v25, 0  ;;  %v114_v45 = vperm.slane %v98_v37, 0 }
   0xc   :  { %52 = vperm.xlu1 %263, %v47_v6   ;;  %26 = vperm.xlu0 %262, %v21_v7  }
   0xd   :  { %78 = vperm.xlu2 %264, %v73_v8  }
  0x14   :  { %59 = vperm.xlu1 %263, %v54_v9   ;;  %33 = vperm.xlu0 %262, %v28_v10  }
  0x15   :  { %85 = vperm.xlu2 %264, %v80_v11  }
  0x1c   :  { %111 = vperm.xlu1 %263, %v106_v13   ;;  %104 = vperm.xlu0 %262, %v99_v14  }
  0x67   :  { %v79_v15 = vpop.permute.xlu2 %78 }
  0x68   :  { %v91_v40 = vsub.f32 %v87_v30, %v79_v15 }
  0x6a   :  { %v93_v47 = vand.u32 2147483647, %v91_v40 }
  0x6f   :  { %v86_v39 = vpop.permute.xlu2 %85 }
  0x70   :  { %v92_v44 = vsub.f32 %v88_v34, %v86_v39 }
  0x72   :  { %v94_v52 = vand.u32 2147483647, %v92_v44 }
  0x7e   :  { %v53_v17 = vpop.permute.xlu1 %52  ;;  %v27_v18 = vpop.permute.xlu0 %26 }
  0x7f   :  { %v65_v28 = vsub.f32 %v61_v22, %v53_v17  ;;  %v39_v31 = vsub.f32 %v35_v23, %v27_v18 }
  0x81   :  { %v67_v38 = vand.u32 2147483647, %v65_v28  ;;  %v41_v41 = vand.u32 2147483647, %v39_v31 }
  0x83   :  { %v69_v48 = vadd.f32 %v67_v38, %v41_v41 }
  0x85   :  { %v95_v57 = vadd.f32 %v93_v47, %v69_v48 }
  0x86   :  { %v60_v32 = vpop.permute.xlu1 %59  ;;  %v34_v33 = vpop.permute.xlu0 %33 }
  0x87   :  { %v66_v35 = vsub.f32 %v62_v26, %v60_v32  ;;  %v40_v36 = vsub.f32 %v36_v27, %v34_v33 }
  0x89   :  { %v68_v42 = vand.u32 2147483647, %v66_v35  ;;  %v42_v43 = vand.u32 2147483647, %v40_v36 }
  0x8b   :  { %v70_v49 = vadd.f32 %v68_v42, %v42_v43 }
  0x8d   :  { %v96_v55 = vadd.f32 %v94_v52, %v70_v49 }
  0x8e   :  { %v112_v50 = vpop.permute.xlu1 %111  ;;  %v105_v51 = vpop.permute.xlu0 %104 }
  0x8f   :  { %v118_v53 = vsub.f32 %v114_v45, %v112_v50  ;;  %v117_v54 = vsub.f32 %v113_v46, %v105_v51 }
  0x91   :  { %v120_v56 = vand.u32 2147483647, %v118_v53  ;;  %v119_v58 = vand.u32 2147483647, %v117_v54 }
  0x93   :  { %v122_v59 = vadd.f32 %v120_v56, %v96_v55   ;;  %v121_v60 = vadd.f32 %v119_v58, %v95_v57  }
  0x94 LB: > { %v136_v62 = vstv %s295_s0  ;;  %vm142_vm0 = vcmask 59392   ;;  %vm157_vm2 = vcmask 64512   ;;  %vm199_vm8 = vcmask 1041409   ;;  %s132_s0 = sadd.s32 1, %s295_s0   ;;  %s295_s0 = sphi %s349_s0, %s132_s0   ;;  %v291_v60 = vphi %v121_v60, %v208_v60   ;;  %v287_v59 = vphi %v122_v59, %v209_v59   ;;  %v283_v61 = vphi %v343_v61, %v390_v61  }
  0x95   : > { %vm137_vm1 = vcmp.eq.s32.totalorder %v312_v1, %v136_v62  ;;  %vm198_vm9 = vcmp.eq.s32.totalorder %v314_v2, %v136_v62  ;;  %p129_p0 = scmp.ge.s32.totalorder %s132_s0, 3  }
  0x96   : > { %v140_v63 = vsel %vm137_vm1, %v291_v60, 1e+30  ;;  %v141_v0 = vsel %vm137_vm1, %v287_v59, 1e+30  ;;  %vm210_vm11 = vcmask (%p129_p0), 17408  }
  0x97   : > { %v143_v3 = vsel %vm142_vm0, %v140_v63, inf  ;;  %v150_v4 = vsel %vm142_vm0, %v141_v0, inf }
  0x98   : > { %v144_v5 = vrot.slane %v143_v3, 4  ;;  %v151_v6 = vrot.slane %v150_v4, 4 }
  0x9a   : > { %v145_v7 = vmin.f32 %v143_v3, %v144_v5  ;;  %v152_v8 = vmin.f32 %v150_v4, %v151_v6 }
  0x9c   : > { %v146_v9 = vrot.slane %v145_v7, 2  ;;  %v153_v10 = vrot.slane %v152_v8, 2 }
  0x9e   : > { %v147_v11 = vmin.f32 %v145_v7, %v146_v9  ;;  %v154_v12 = vmin.f32 %v152_v8, %v153_v10 }
  0xa0   : > { %v148_v13 = vrot.slane %v147_v11, 1  ;;  %v155_v15 = vrot.slane %v154_v12, 1 }
  0xa2   : > { %v149_v14 = vmin.f32 %v147_v11, %v148_v13  ;;  %v156_v17 = vmin.f32 %v154_v12, %v155_v15 }
  0xa4   : > { %v158_v16 = vsel %vm157_vm2, %v149_v14, inf  ;;  %v161_v18 = vsel %vm157_vm2, %v156_v17, inf }
  0xa5   : > { %159 = vmin.xlane.f32.xlu0 %v158_v16 }
  0xad   : > { %162 = vmin.xlane.f32.xlu0 %v161_v18 }
 0x118   : > { %v160_v19 = vpop.xlane.xlu0 %159 }
 0x119   : > { %vm164_vm3 = vcmp.le.f32.partialorder %v149_v14, %v160_v19 }
 0x11a   : > { %v166_v20 = vsel %vm164_vm3, %v314_v2, 8 }
 0x11b   : > { %v168_v21 = vsel %vm157_vm2, %v166_v20, 2147483647 }
 0x11c   : > { %v170_v22 = vshra.s32 %v168_v21, 16  ;;  %v169_v29 = vand.u32 65535, %v168_v21 }
 0x11e   : > { %v172_v23 = vcvt.s32.f32 %v170_v22  ;;  %v171_v31 = vcvt.s32.f32 %v169_v29 }
 0x120   : > { %173 = vmin.xlane.f32.xlu1 %v172_v23  ;;  %v163_v24 = vpop.xlane.xlu0 %162 }
 0x121   : > { %vm165_vm4 = vcmp.le.f32.partialorder %v156_v17, %v163_v24 }
 0x122   : > { %v167_v25 = vsel %vm165_vm4, %v314_v2, 8 }
 0x123   : > { %v183_v26 = vsel %vm157_vm2, %v167_v25, 2147483647 }
 0x124   : > { %v185_v27 = vshra.s32 %v183_v26, 16  ;;  %v184_v33 = vand.u32 65535, %v183_v26 }
 0x126   : > { %v187_v28 = vcvt.s32.f32 %v185_v27  ;;  %v186_v35 = vcvt.s32.f32 %v184_v33 }
 0x128   : > { %188 = vmin.xlane.f32.xlu1 %v187_v28 }
 0x193   : > { %v174_v30 = vpop.xlane.xlu1 %173 }
 0x194   : > { %vm175_vm5 = vcmp.eq.f32.partialorder %v172_v23, %v174_v30  ;;  %v180_v37 = vcvt.f32.s32 %v174_v30 }
 0x195   : > { %v176_v32 = vsel %vm175_vm5, %v171_v31, inf }
 0x196   : > { %177 = vmin.xlane.f32.xlu2 %v176_v32  ;;  %v181_v39 = vshll.u32 %v180_v37, 16 }
 0x19b   : > { %v189_v34 = vpop.xlane.xlu1 %188 }
 0x19c   : > { %vm190_vm6 = vcmp.eq.f32.partialorder %v187_v28, %v189_v34  ;;  %v195_v42 = vcvt.f32.s32 %v189_v34 }
 0x19d   : > { %v191_v36 = vsel %vm190_vm6, %v186_v35, inf }
 0x19e   : > { %192 = vmin.xlane.f32.xlu2 %v191_v36  ;;  %v196_v44 = vshll.u32 %v195_v42, 16 }
 0x209   : > { %v178_v38 = vpop.xlane.xlu2 %177 }
 0x20a   : > { %v179_v40 = vcvt.f32.s32 %v178_v38 }
 0x20c   : > { %v182_v41 = vadd.s32 %v181_v39, %v179_v40 }
 0x20e   : > { %vm202_vm7 = vcmp.eq.s32.totalorder %v314_v2, %v182_v41 }
 0x20f   : > { %v208_v60 = vsel %vm202_vm7, 1e+30, %v291_v60  }
 0x211   : > { %v193_v43 = vpop.xlane.xlu2 %192 }
 0x212   : > { %v194_v45 = vcvt.f32.s32 %v193_v43 }
 0x214   : > { %v197_v46 = vadd.s32 %v196_v44, %v194_v45  ;;  %131 = sbr.rel (!%p129_p0) target bundleno = 148 (0x94), region = 35 }
 0x216   : > { %v200_v47 = vsel %vm199_vm8, %v197_v46, %v182_v41  ;;  %vm203_vm10 = vcmp.eq.s32.totalorder %v314_v2, %v197_v46 }
 0x217   : > { %v201_v48 = vsel %vm198_vm9, %v200_v47, %v283_v61   ;;  %v209_v59 = vsel %vm203_vm10, 1e+30, %v287_v59  }
 0x218   : > { %v390_v61 = vmov %v201_v48  ;;  %211 = vst.msk [vmem:[%s388_s2] sm:$0x3] (%p129_p0), %vm210_vm11, %v201_v48 }

// kernel: custom_set_criterion.4
= control target key start
LH: loop header
LB: loop body
LE: loop exit
PB: predicated region body
PF: predicated region fallthrough
CT: control target
= control target key end

     0   :  { %vm114_vm0 = vcmask 56320   ;;  %v325_v1 = vmov 0   ;;  %v104_v15 = vlaneseq  ;;  %vm202_vm9 = vcmask 15368   ;;  %s434_s0 = inlined_call_operand.vmem [shape: f32[16,7], index: 0, kind: input, shape index: {}]   ;;  %s435_s1 = inlined_call_operand.vmem [shape: f32[16,8], index: 1, kind: input, shape index: {}]   ;;  %s436_s2 = inlined_call_operand.vmem [shape: f32[8,128], index: 2, kind: output, shape index: {}]  }
   0x1   :  { %v348_v0 = vld [vmem:[%s434_s0] sm:$0xff]  ;;  %306 = vset.pattern.permute.xlu2 %v325_v1  ;;  %v360_v4 = vld [vmem:[%s435_s1 + $0x8] sm:$0xff]  ;;  %v326_v53 = vmov 1   ;;  %vm236_vm10 = vcmask 23568  }
   0x2   :  { %v353_v2 = vld [vmem:[%s435_s1] sm:$0xff]  ;;  %v115_v3 = vsel %vm114_vm0, %v348_v0, -inf  ;;  %v81_v7 = vld [vmem:[%s434_s0 + $0x8] sm:$0xff]  ;;  %v297_v9 = vceil.f32 %v360_v4  ;;  %v298_v10 = vfloor.f32 %v360_v4  ;;  %vm296_vm2 = vcmp.lt.s32.totalorder %v360_v4, 0  ;;  %313 = vset.pattern.permute.xlu1 %v326_v53  ;;  %312 = vset.pattern.permute.xlu0 %v326_v53  ;;  %s329_s0 = smov 2  }
   0x3   :  { %vm291_vm1 = vcmp.lt.s32.totalorder %v353_v2, 0  ;;  %v292_v5 = vceil.f32 %v353_v2  ;;  %116 = vmax.xlane.f32.xlu0 %v115_v3  ;;  %v293_v6 = vfloor.f32 %v353_v2  ;;  %v118_v12 = vsel %vm114_vm0, %v81_v7, -inf }
   0x4   :  { %v377_v13 = vsel %vm296_vm2, %v297_v9, %v298_v10  ;;  %v382_v16 = vand.u32 127, %v104_v15  ;;  %v219_v49 = vsel %vm202_vm9, %v353_v2, 0.0  ;;  %v220_v50 = vsel %vm202_vm9, %v360_v4, 0.0 }
   0x5   :  { %v368_v8 = vsel %vm291_vm1, %v292_v5, %v293_v6  ;;  %v300_v14 = vcvt.f32.s32 %v377_v13  ;;  %v221_v51 = vadd.f32 %v220_v50, %v219_v49  ;;  %v254_v3 = vsel %vm236_vm10, %v353_v2, 0.0 }
   0x6   :  { %v295_v11 = vcvt.f32.s32 %v368_v8  ;;  %v255_v5 = vsel %vm236_vm10, %v360_v4, 0.0  ;;  %v327_v6 = vmov 2   ;;  %vm228_vm13 = vcmp.eq.s32.totalorder %v382_v16, 1 }
   0x7   :  { %v222_v56 = vrot.slane %v221_v51, 4  ;;  %v256_v10 = vadd.f32 %v255_v5, %v254_v3  ;;  %vm212_vm14 = vcmp.eq.s32.totalorder %v382_v16, 0  ;;  %vm246_vm15 = vcmp.eq.s32.totalorder %v382_v16, 2 }
   0x8   :  { %107 = vperm.xlu2 %306, %v295_v11  }
   0x9   :  { %v223_v60 = vadd.f32 %v222_v56, %v221_v51 }
   0xb   :  { %119 = vmax.xlane.f32.xlu0 %v118_v12  ;;  %v224_v9 = vrot.slane %v223_v60, 2 }
  0x10   :  { %110 = vperm.xlu2 %306, %v300_v14  }
  0x18   :  { %314 = vset.pattern.permute.xlu2 %v327_v6 }
  0x62   :  { %v108_v34 = vpop.permute.xlu2 %107 }
  0x63   :  { %vm112_vm7 = vcmp.eq.s32.totalorder %v382_v16, %v108_v34 }
  0x64   :  { %v139_v45 = vsel %vm112_vm7, %v348_v0, 0.0 }
  0x65   :  { %v141_v47 = vsel %vm114_vm0, %v139_v45, 0.0 }
  0x6a   :  { %v111_v42 = vpop.permute.xlu2 %110 }
  0x6b   :  { %vm113_vm8 = vcmp.eq.s32.totalorder %v382_v16, %v111_v42 }
  0x6c   :  { %v140_v46 = vsel %vm113_vm8, %v81_v7, 0.0 }
  0x6d   :  { %v144_v48 = vsel %vm114_vm0, %v140_v46, 0.0 }
  0x76   :  { %v384_v17 = vpop.xlane.xlu0 %116 }
  0x77   :  { %v121_v18 = vsub.f32 %v348_v0, %v384_v17  ;;  %vm151_vm3 = vcmp.ge.f32.partialorder %v348_v0, %v384_v17 }
  0x78   :  { %v153_v19 = vsel %vm151_vm3, %v382_v16, 7 }
  0x79   :  { %v123_v20 = vmul.f32 1.442695, %v121_v18  ;;  %v155_v21 = vsel %vm114_vm0, %v153_v19, 2147483647  ;;  %v257_v18 = vrot.slane %v256_v10, 4  ;;  %v225_v19 = vadd.f32 %v224_v9, %v223_v60 }
  0x7a   :  { %v157_v22 = vshra.s32 %v155_v21, 16  ;;  %v156_v32 = vand.u32 65535, %v155_v21 }
  0x7b   :  { %317 = vpow2.f32 %v123_v20  ;;  %v328_v20 = vmov 0.0  }
  0x7c   :  { %v159_v23 = vcvt.s32.f32 %v157_v22  ;;  %v158_v36 = vcvt.s32.f32 %v156_v32 }
  0x7e   :  { %160 = vmin.xlane.f32.xlu1 %v159_v23  ;;  %v392_v24 = vpop.xlane.xlu0 %119 }
  0x7f   :  { %vm152_vm4 = vcmp.ge.f32.partialorder %v81_v7, %v392_v24  ;;  %v122_v31 = vsub.f32 %v81_v7, %v392_v24 }
  0x80   :  { %v154_v25 = vsel %vm152_vm4, %v382_v16, 7 }
  0x81   :  { %v318_v26 = vpop.eup %317  ;;  %v170_v27 = vsel %vm114_vm0, %v154_v25, 2147483647  ;;  %v125_v33 = vmul.f32 1.442695, %v122_v31 }
  0x82   :  { %v127_v28 = vsel %vm114_vm0, %v318_v26, 0.0  ;;  %v172_v29 = vshra.s32 %v170_v27, 16  ;;  %v171_v38 = vand.u32 65535, %v170_v27 }
  0x83   :  { %128 = vadd.xlane.f32.xlu2 %v127_v28  ;;  %319 = vpow2.f32 %v125_v33 }
  0x84   :  { %v174_v30 = vcvt.s32.f32 %v172_v29  ;;  %v173_v41 = vcvt.s32.f32 %v171_v38 }
  0x86   :  { %175 = vmin.xlane.f32.xlu1 %v174_v30 }
  0x89   :  { %v320_v39 = vpop.eup %319 }
  0x8a   :  { %v130_v44 = vsel %vm114_vm0, %v320_v39, 0.0  ;;  %vm263_vm0 = vcmp.eq.s32.totalorder %v382_v16, 3 }
  0xf1   :  { %v161_v35 = vpop.xlane.xlu1 %160 }
  0xf2   :  { %vm162_vm5 = vcmp.eq.f32.partialorder %v159_v23, %v161_v35  ;;  %v167_v55 = vcvt.f32.s32 %v161_v35  ;;  %v258_v23 = vadd.f32 %v257_v18, %v256_v10 }
  0xf3   :  { %v163_v37 = vsel %vm162_vm5, %v158_v36, inf }
  0xf4   :  { %164 = vmin.xlane.f32.xlu0 %v163_v37  ;;  %v168_v59 = vshll.u32 %v167_v55, 16  ;;  %v259_v13 = vrot.slane %v258_v23, 2 }
  0xf6   :  { %v129_v52 = vpop.xlane.xlu2 %128  ;;  %v260_v35 = vadd.f32 %v259_v13, %v258_v23 }
  0xf7   :  { %321 = vlog2.f32 %v129_v52 }
  0xf8   :  { %v261_v38 = vrot.slane %v260_v35, 1 }
  0xf9   :  { %v176_v40 = vpop.xlane.xlu1 %175 }
  0xfa   :  { %vm177_vm6 = vcmp.eq.f32.partialorder %v174_v30, %v176_v40  ;;  %v182_v58 = vcvt.f32.s32 %v176_v40 }
  0xfb   :  { %v178_v43 = vsel %vm177_vm6, %v173_v41, inf  ;;  %v262_v41 = vadd.f32 %v261_v38, %v260_v35 }
  0xfc   :  { %179 = vmin.xlane.f32.xlu1 %v178_v43  ;;  %131 = vadd.xlane.f32.xlu0 %v130_v44  ;;  %v183_v63 = vshll.u32 %v182_v58, 16 }
  0xfd   :  { %v322_v61 = vpop.eup %321 }
  0xfe   :  { %v134_v12 = vmul.f32 0.6931472, %v322_v61 }
 0x100   :  { %v137_v26 = vadd.f32 %v134_v12, %v384_v17 }
 0x104   :  { %142 = vadd.xlane.f32.xlu1 %v141_v47  ;;  %145 = vadd.xlane.f32.xlu0 %v144_v48 }
 0x167   :  { %v165_v54 = vpop.xlane.xlu0 %164 }
 0x168   :  { %v166_v57 = vcvt.f32.s32 %v165_v54 }
 0x16a   :  { %v169_v62 = vadd.s32 %v168_v59, %v166_v57 }
 0x16c   :  { %vm185_vm11 = vcmp.eq.s32.totalorder %v169_v62, %v295_v11  ;;  %v226_v11 = vrot.slane %v225_v19, 1 }
 0x16d   :  { %v289_v21 = vsel %vm185_vm11, 1.0, %v328_v20 }
 0x16e   :  { %v227_v33 = vadd.f32 %v226_v11, %v225_v19 }
 0x16f   :  { %v180_v0 = vpop.xlane.xlu1 %179  ;;  %v132_v1 = vpop.xlane.xlu0 %131 }
 0x170   :  { %v181_v7 = vcvt.f32.s32 %v180_v0  ;;  %323 = vlog2.f32 %v132_v1 }
 0x172   :  { %v184_v15 = vadd.s32 %v183_v63, %v181_v7 }
 0x174   :  { %vm186_vm12 = vcmp.eq.s32.totalorder %v184_v15, %v300_v14 }
 0x175   :  { %v290_v22 = vsel %vm186_vm12, 1.0, %v328_v20 }
 0x176   :  { %v324_v25 = vpop.eup %323  ;;  %v307_v27 = vpack.i.bf16 %v290_v22, %v289_v21 }
 0x177   :  { %v136_v28 = vmul.f32 0.6931472, %v324_v25  ;;  %v143_v29 = vpop.xlane.xlu1 %142  ;;  %v146_v8 = vpop.xlane.xlu0 %145 }
 0x178   :  { %v147_v30 = vsub.f32 %v137_v26, %v143_v29  ;;  %308 = vrot.lane.b32.xlu1 %v307_v27, %s329_s0 }
 0x179   :  { %v138_v31 = vadd.f32 %v136_v28, %v392_v24 }
 0x17a   :  { %v149_v14 = vmul.f32 %v147_v30, %v353_v2 }
 0x17b   :  { %v148_v32 = vsub.f32 %v138_v31, %v146_v8 }
 0x17c   :  { %v203_v17 = vsel %vm202_vm9, %v149_v14, 0.0 }
 0x17d   :  { %v150_v34 = vmul.f32 %v148_v32, %v360_v4 }
 0x17f   :  { %v204_v36 = vsel %vm202_vm9, %v150_v34, 0.0 }
 0x180   :  { %v205_v37 = vadd.f32 %v204_v36, %v203_v17  ;;  %231 = vperm.xlu1 %313, %v227_v33  }
 0x182   :  { %v206_v39 = vrot.slane %v205_v37, 4 }
 0x184   :  { %v207_v40 = vadd.f32 %v206_v39, %v205_v37 }
 0x186   :  { %v208_v42 = vrot.slane %v207_v40, 2 }
 0x188   :  { %v209_v24 = vadd.f32 %v208_v42, %v207_v40  ;;  %315 = vset.pattern.permute.xlu1 %v327_v6 }
 0x189   :  { %266 = vperm.xlu1 %315, %v262_v41  }
 0x18a   :  { %v210_v43 = vrot.slane %v209_v24, 1 }
 0x18c   :  { %v211_v44 = vadd.f32 %v210_v43, %v209_v24 }
 0x18e   :  { %215 = vperm.xlu0 %312, %v211_v44  }
 0x196   :  { %316 = vset.pattern.permute.xlu0 %v327_v6 }
 0x1ea   :  { %v309_v45 = vpop.permute.xlu1 %308 }
 0x1eb   :  { %v311_v46 = vunpack.i.h.bf16 %v309_v45  ;;  %v310_v47 = vunpack.i.l.bf16 %v309_v45 }
 0x1ed   :  { %v200_v48 = vmul.f32 %v311_v46, %v360_v4  ;;  %v199_v49 = vmul.f32 %v310_v47, %v353_v2 }
 0x1ef   :  { %v238_v50 = vsel %vm236_vm10, %v200_v48, 0.0  ;;  %v237_v51 = vsel %vm236_vm10, %v199_v49, 0.0 }
 0x1f0   :  { %v239_v52 = vadd.f32 %v238_v50, %v237_v51 }
 0x1f2   :  { %v240_v53 = vrot.slane %v239_v52, 4  ;;  %v232_v59 = vpop.permute.xlu1 %231 }
 0x1f3   :  { %v234_v60 = vsel %vm228_vm13, %v232_v59, 0.0 }
 0x1f4   :  { %v241_v54 = vadd.f32 %v240_v53, %v239_v52 }
 0x1f6   :  { %v242_v55 = vrot.slane %v241_v54, 2 }
 0x1f8   :  { %v243_v56 = vadd.f32 %v242_v55, %v241_v54 }
 0x1fa   :  { %v244_v57 = vrot.slane %v243_v56, 1 }
 0x1fb   :  { %v267_v61 = vpop.permute.xlu1 %266 }
 0x1fc   :  { %v245_v58 = vadd.f32 %v244_v57, %v243_v56  ;;  %v269_v1 = vsel %vm263_vm0, %v267_v61, 0.0 }
 0x1fe   :  { %249 = vperm.xlu2 %314, %v245_v58  }
 0x200   :  { %v216_v4 = vpop.permute.xlu0 %215 }
 0x201   :  { %v218_v2 = vsel %vm212_vm14, %v216_v4, 0.0 }
 0x202   :  { %v235_v62 = vadd.f32 %v234_v60, %v218_v2 }
 0x258   :  { %v250_v63 = vpop.permute.xlu2 %249 }
 0x259   :  { %v252_v0 = vsel %vm246_vm15, %v250_v63, 0.0 }
 0x25a   :  { %v253_v3 = vadd.f32 %v252_v0, %v235_v62 }
 0x25c   :  { %v270_v5 = vadd.f32 %v269_v1, %v253_v3 }
 0x25e   :  { %272 = vst [vmem:[%s436_s2] sm:$0xff] %v270_v5 }

</bundles_post_ra>
